<compile_context>
chip_gen: v6e
topology: v6e:2x2x1
jax: 0.10.0
libtpu: 0.0.40
codegen_flags: <defaults>
</compile_context>

<pallas_src>
import jax
import jax.numpy as jnp
import numpy as np
from jax import lax
from jax.experimental import pallas as pl
from jax.experimental.pallas import tpu as pltpu

# Module-consistent dims: DecisionNet(inputs=[I, H, H2], output_size=O)
B, T, I, H, H2, O = 16, 8, 16, 32, 32, 2
LANES = 128
BB = 8                      # batch rows per grid step (f32 sublane tile)
NB = B // BB                # grid size over batch
assert 4 * H == LANES, "gate block assumes 4*H == 128 lanes"
assert B % BB == 0


def _round_up(x, m):
    return (x + m - 1) // m * m


# --- packed parameter-slab row offsets (all sections 8-row aligned) -------------
R_WIH = 0                              # (I, 4H)   input->gates weights (cols [i|f|o|g])
R_WHH = R_WIH + I                      # (H, 4H)   hidden->gates weights
R_BIH = R_WHH + H                      # (1, 4H)   combined bias b_ih + b_hh
R_W1 = _round_up(R_BIH + 1, 8)         # (H, 128)  linear1 weights, real lanes 0:H2
R_B1 = R_W1 + H                        # (1, 128)  linear1 bias,    real lanes 0:H2
R_W2 = _round_up(R_B1 + 1, 8)          # (H2, 128) linear2 weights, real lanes 0:O
R_B2 = R_W2 + H2                       # (1, 128)  linear2 bias,    real lanes 0:O
SLAB_ROWS = _round_up(R_B2 + 1, 8)

# Gate permutation: PyTorch order [i, f, g, o] -> kernel order [i, f, o, g]
GATE_PERM = np.concatenate([np.arange(0, H), np.arange(H, 2 * H),
                            np.arange(3 * H, 4 * H), np.arange(2 * H, 3 * H)])

# Output slab layout (lane ranges): [ act0 | act1 | probs | zero pad ]
OUT_A0, OUT_A1, OUT_P = 0, H, H + H2


def decision_net_kernel(x_ref, w_ref, out_ref, xg_ref):
    """x_ref: (T*BB, I) time-major slab for this batch block.
    w_ref: (SLAB_ROWS, 128) packed params (constant index_map -> resident across grid).
    out_ref: (BB, 128) lane-dense result slab.  xg_ref: (T*BB, 4H) VMEM scratch."""
    wih = w_ref[R_WIH:R_WIH + I, :]          # (I, 4H)
    whh = w_ref[R_WHH:R_WHH + H, :]          # (H, 4H) -- reused every recurrent step
    bih = w_ref[R_BIH:R_BIH + 1, :]          # (1, 4H)

    # Hoisted input projection + bias: one MXU call off the serial h-dependency chain.
    # Staged in VMEM so the recurrence does aligned pl.ds sublane loads per step.
    xg_ref[...] = jnp.dot(x_ref[...], wih, preferred_element_type=jnp.float32) + bih

    def step(t, carry):
        h, c = carry
        row = pl.multiple_of(t * BB, BB)
        gates = xg_ref[pl.ds(row, BB), :] + jnp.dot(
            h, whh, preferred_element_type=jnp.float32)        # (BB, 4H), order [i|f|o|g]
        sig = jax.nn.sigmoid(gates[:, :3 * H])                  # one EUP op over i,f,o
        g_g = jnp.tanh(gates[:, 3 * H:])                        # one EUP op over g
        i_g = sig[:, 0:H]
        f_g = sig[:, H:2 * H]
        o_g = sig[:, 2 * H:3 * H]
        c_new = f_g * c + i_g * g_g
        h_new = o_g * jnp.tanh(c_new)
        return (h_new, c_new)

    h0 = jnp.zeros((BB, H), jnp.float32)
    c0 = jnp.zeros((BB, H), jnp.float32)
    h, _ = lax.fori_loop(0, T, step, (h0, c0), unroll=True)

    # Epilogue weights are loaded only here (after the recurrence) to keep vreg
    # pressure low on the serial chain.
    w1 = w_ref[R_W1:R_W1 + H, :]             # (H, 128)  zero-padded lanes H2:
    b1 = w_ref[R_B1:R_B1 + 1, :]             # (1, 128)
    a1_full = jnp.maximum(
        jnp.dot(h, w1, preferred_element_type=jnp.float32) + b1, 0.0)        # (BB, 128)

    w2 = w_ref[R_W2:R_W2 + H2, :]            # (H2, 128) only the 32 real K rows stored
    b2 = w_ref[R_B2:R_B2 + 1, :]             # (1, 128)
    z_full = jnp.maximum(
        jnp.dot(a1_full[:, :H2], w2, preferred_element_type=jnp.float32) + b2, 0.0)

    # 2-way softmax as sigmoid of logit difference (identical math, no reductions).
    z0 = z_full[:, 0:1]
    z1 = z_full[:, 1:2]
    p0 = jax.nn.sigmoid(z0 - z1)
    p1 = 1.0 - p0

    # Concat-free epilogue: zero base + direct slice stores into the lane-dense slab.
    out_ref[...] = jnp.zeros((BB, LANES), jnp.float32)
    out_ref[:, OUT_A0:OUT_A0 + H] = h
    out_ref[:, OUT_A1:OUT_A1 + H2] = a1_full[:, :H2]
    out_ref[:, OUT_P:OUT_P + 1] = p0
    out_ref[:, OUT_P + 1:OUT_P + 2] = p1


_FLOPS = (2 * T * B * I * 4 * H        # hoisted input projection
          + 2 * T * B * H * 4 * H      # recurrent matmuls
          + 2 * B * H * LANES          # linear 1 (lane padded)
          + 2 * B * H2 * LANES         # linear 2 (32 K rows)
          + 12 * T * B * H)            # gate elementwise
_TRANS = T * B * 5 * H + B
_BYTES = (T * B * I + SLAB_ROWS * LANES + B * LANES) * 4


@jax.jit
def decision_net_forward(x_bti, param_slab):
    """x_bti: (B, T, I) batch_first like PyTorch; returns (softmax_out, [act0, act1])."""
    # Relayout batch_first -> per-batch-block time-major slabs (NB, T*BB, I) in XLA.
    # (Doing this inside the kernel would force a sublane relayout copy.)
    # TODO(synk): callers that can supply time-major data should skip this transpose.
    x_blk = (jnp.transpose(x_bti, (1, 0, 2))        # (T, B, I)
             .reshape(T, NB, BB, I)
             .transpose(1, 0, 2, 3)                 # (NB, T, BB, I)
             .reshape(NB, T * BB, I))

    out_slab = pl.pallas_call(
        decision_net_kernel,
        out_shape=jax.ShapeDtypeStruct((B, LANES), jnp.float32),
        grid=(NB,),
        in_specs=[
            pl.BlockSpec((None, T * BB, I), lambda b: (b, 0, 0)),
            # Constant index_map -> the param slab is DMA'd once and stays resident.
            pl.BlockSpec((SLAB_ROWS, LANES), lambda b: (0, 0)),
        ],
        out_specs=pl.BlockSpec((BB, LANES), lambda b: (b, 0)),
        scratch_shapes=[pltpu.VMEM((T * BB, 4 * H), jnp.float32)],
        compiler_params=pltpu.CompilerParams(
            dimension_semantics=("parallel",)),
        cost_estimate=pl.CostEstimate(flops=_FLOPS, transcendentals=_TRANS,
                                      bytes_accessed=_BYTES),
    )(x_blk, param_slab)

    act0 = out_slab[:, OUT_A0:OUT_A0 + H]
    act1 = out_slab[:, OUT_A1:OUT_A1 + H2]
    probs = out_slab[:, OUT_P:OUT_P + O]
    return probs, [act0, act1]


def init_raw_params(key):
    """PyTorch-style raw parameters (uniform +-1/sqrt(fan), standard [i,f,g,o] gate order)."""
    ks = jax.random.split(key, 8)
    k_l = 1.0 / np.sqrt(H)
    w_ih = jax.random.uniform(ks[0], (4 * H, I), jnp.float32, -k_l, k_l)
    w_hh = jax.random.uniform(ks[1], (4 * H, H), jnp.float32, -k_l, k_l)
    b_ih = jax.random.uniform(ks[2], (4 * H,), jnp.float32, -k_l, k_l)
    b_hh = jax.random.uniform(ks[3], (4 * H,), jnp.float32, -k_l, k_l)
    k1 = 1.0 / np.sqrt(H)
    w1 = jax.random.uniform(ks[4], (H2, H), jnp.float32, -k1, k1)
    b1 = jax.random.uniform(ks[5], (H2,), jnp.float32, -k1, k1)
    k2 = 1.0 / np.sqrt(H2)
    w2 = jax.random.uniform(ks[6], (O, H2), jnp.float32, -k2, k2)
    b2 = jax.random.uniform(ks[7], (O,), jnp.float32, -k2, k2)
    return (w_ih, w_hh, b_ih, b_hh, w1, b1, w2, b2)


def pack_params(raw):
    """Pack PyTorch-style params into a single lane-dense (SLAB_ROWS, 128) f32 slab.
    Gate columns are permuted [i,f,g,o] -> [i,f,o,g]; the two LSTM biases are folded.
    Invariant: lanes beyond H2 of w1/b1 and beyond O of w2/b2 stay exact zeros."""
    w_ih, w_hh, b_ih, b_hh, w1, b1, w2, b2 = raw
    wih_k = jnp.transpose(w_ih[GATE_PERM, :])      # (I, 4H)
    whh_k = jnp.transpose(w_hh[GATE_PERM, :])      # (H, 4H)
    bih_k = (b_ih + b_hh)[GATE_PERM]               # (4H,)

    slab = jnp.zeros((SLAB_ROWS, LANES), jnp.float32)
    slab = slab.at[R_WIH:R_WIH + I, :].set(wih_k)
    slab = slab.at[R_WHH:R_WHH + H, :].set(whh_k)
    slab = slab.at[R_BIH, :].set(bih_k)
    slab = slab.at[R_W1:R_W1 + H, :H2].set(w1.T)
    slab = slab.at[R_B1, :H2].set(b1)
    slab = slab.at[R_W2:R_W2 + H2, :O].set(w2.T)
    slab = slab.at[R_B2, :O].set(b2)
    return slab


def reference_forward(x_bti, raw):
    """Pure-JAX reference mirroring the PyTorch forward (standard gate order, exp/sum softmax)."""
    w_ih, w_hh, b_ih, b_hh, w1, b1, w2, b2 = raw
    bt = x_bti.shape[0]
    wih_t, whh_t, bias = w_ih.T, w_hh.T, (b_ih + b_hh)[None, :]
    h = jnp.zeros((bt, H), jnp.float32)
    c = jnp.zeros((bt, H), jnp.float32)
    for t in range(T):
        gates = x_bti[:, t, :] @ wih_t + h @ whh_t + bias
        i_g = jax.nn.sigmoid(gates[:, 0 * H:1 * H])
        f_g = jax.nn.sigmoid(gates[:, 1 * H:2 * H])
        g_g = jnp.tanh(gates[:, 2 * H:3 * H])
        o_g = jax.nn.sigmoid(gates[:, 3 * H:4 * H])
        c = f_g * c + i_g * g_g
        h = o_g * jnp.tanh(c)
    a1 = jax.nn.relu(h @ w1.T + b1)
    z = jax.nn.relu(a1 @ w2.T + b2)
    return jax.nn.softmax(z, axis=-1), [h, a1]


if __name__ == "__main__":
    key = jax.random.PRNGKey(0)
    k_x, k_p = jax.random.split(key)
    x = jax.random.normal(k_x, (B, T, I), jnp.float32)   # batch_first, like PyTorch
    raw_params = init_raw_params(k_p)
    param_slab = pack_params(raw_params)

    out, acts = decision_net_forward(x, param_slab)
    out = jax.block_until_ready(out)

    ref_out, ref_acts = reference_forward(x, raw_params)
    np.testing.assert_allclose(np.asarray(out), np.asarray(ref_out), rtol=1e-5, atol=1e-5)
    np.testing.assert_allclose(np.asarray(acts[0]), np.asarray(ref_acts[0]), rtol=1e-5, atol=1e-5)
    np.testing.assert_allclose(np.asarray(acts[1]), np.asarray(ref_acts[1]), rtol=1e-5, atol=1e-5)
    assert out.shape == (B, O)
    np.testing.assert_allclose(np.asarray(out).sum(-1), np.ones(B), rtol=1e-5, atol=1e-5)

    print("KERNEL_OK")
</pallas_src>

<mosaic_0001>
module attributes {stable_mosaic.version = 11 : i64} {
  func.func @decision_net_kernel(%arg0: i32, %arg1: memref<1x64x16xf32, #tpu.memory_space<vmem>>, %arg2: memref<136x128xf32, #tpu.memory_space<vmem>>, %arg3: memref<8x128xf32, #tpu.memory_space<vmem>>, %arg4: memref<64x128xf32, #tpu.memory_space<vmem>>) attributes {dimension_semantics = [#tpu.dimension_semantics<parallel>], iteration_bounds = array<i64: 2>, scalar_prefetch = 0 : i64, scratch_operands = 1 : i64, tpu.core_type = #tpu.core_type<tc>, window_params = [{transform_indices = @transform_0, window_bounds = array<i64: 1, 64, 16>}, {pipeline_mode = #tpu.pipeline_mode<synchronous>, transform_indices = @transform_1, window_bounds = array<i64: 136, 128>}, {transform_indices = @transform_2, window_bounds = array<i64: 8, 128>}]} {
    %c0 = arith.constant 0 : index
    %c0_0 = arith.constant 0 : index
    %0 = vector.load %arg2[%c0, %c0_0] : memref<136x128xf32, #tpu.memory_space<vmem>>, vector<16x128xf32>
    %c16 = arith.constant 16 : index
    %c0_1 = arith.constant 0 : index
    %1 = vector.load %arg2[%c16, %c0_1] : memref<136x128xf32, #tpu.memory_space<vmem>>, vector<32x128xf32>
    %c48 = arith.constant 48 : index
    %c0_2 = arith.constant 0 : index
    %2 = vector.load %arg2[%c48, %c0_2] : memref<136x128xf32, #tpu.memory_space<vmem>>, vector<1x128xf32>
    %c0_3 = arith.constant 0 : index
    %c0_4 = arith.constant 0 : index
    %c0_5 = arith.constant 0 : index
    %3 = vector.load %arg1[%c0_3, %c0_4, %c0_5] : memref<1x64x16xf32, #tpu.memory_space<vmem>>, vector<1x64x16xf32>
    %4 = vector.shape_cast %3 : vector<1x64x16xf32> to vector<64x16xf32>
    %cst = arith.constant dense<0.000000e+00> : vector<64x128xf32>
    %5 = tpu.matmul %4, %0, %cst {dimension_numbers = #tpu.dot_dimension_numbers<[1], [0], [0], [1], [0, 0, 1, 1], [], []>} : vector<64x16xf32>, vector<16x128xf32>, vector<64x128xf32> -> vector<64x128xf32>
    %6 = vector.broadcast %2 : vector<1x128xf32> to vector<64x128xf32>
    %7 = arith.addf %5, %6 : vector<64x128xf32>
    %c0_6 = arith.constant 0 : index
    %c0_7 = arith.constant 0 : index
    %8 = vector.load %arg4[%c0_6, %c0_7] : memref<64x128xf32, #tpu.memory_space<vmem>>, vector<64x128xf32>
    tpu.vector_store %arg4[%c0_6, %c0_7], %7 {strides = array<i32>} : memref<64x128xf32, #tpu.memory_space<vmem>>, vector<64x128xf32>,
    %cst_8 = arith.constant 0.000000e+00 : f32
    %9 = vector.broadcast %cst_8 : f32 to vector<8x32xf32>
    %cst_9 = arith.constant 0.000000e+00 : f32
    %10 = vector.broadcast %cst_9 : f32 to vector<8x32xf32>
    %c0_i32 = arith.constant 0 : i32
    %c8_i32 = arith.constant 8 : i32
    %11 = arith.muli %c0_i32, %c8_i32 : i32
    %12 = tpu.assume_multiple %11, 8 : i32
    %13 = arith.index_cast %12 : i32 to index
    %c0_10 = arith.constant 0 : index
    %14 = vector.load %arg4[%13, %c0_10] : memref<64x128xf32, #tpu.memory_space<vmem>>, vector<8x128xf32>
    %cst_11 = arith.constant dense<0.000000e+00> : vector<8x128xf32>
    %15 = tpu.matmul %9, %1, %cst_11 {dimension_numbers = #tpu.dot_dimension_numbers<[1], [0], [0], [1], [0, 0, 1, 1], [], []>} : vector<8x32xf32>, vector<32x128xf32>, vector<8x128xf32> -> vector<8x128xf32>
    %16 = arith.addf %14, %15 : vector<8x128xf32>
    %17 = vector.extract_strided_slice %16 {offsets = [0, 0], sizes = [8, 96], strides = [1, 1]} : vector<8x128xf32> to vector<8x96xf32>
    %18 = arith.negf %17 : vector<8x96xf32>
    %19 = math.exp %18 : vector<8x96xf32>
    %cst_12 = arith.constant 1.000000e+00 : f32
    %20 = vector.broadcast %cst_12 : f32 to vector<8x96xf32>
    %21 = arith.addf %20, %19 : vector<8x96xf32>
    %22 = arith.divf %20, %21 : vector<8x96xf32>
    %23 = vector.extract_strided_slice %16 {offsets = [0, 96], sizes = [8, 32], strides = [1, 1]} : vector<8x128xf32> to vector<8x32xf32>
    %24 = math.tanh %23 : vector<8x32xf32>
    %25 = vector.extract_strided_slice %22 {offsets = [0, 0], sizes = [8, 32], strides = [1, 1]} : vector<8x96xf32> to vector<8x32xf32>
    %26 = vector.extract_strided_slice %22 {offsets = [0, 32], sizes = [8, 32], strides = [1, 1]} : vector<8x96xf32> to vector<8x32xf32>
    %27 = vector.extract_strided_slice %22 {offsets = [0, 64], sizes = [8, 32], strides = [1, 1]} : vector<8x96xf32> to vector<8x32xf32>
    %28 = arith.mulf %26, %10 : vector<8x32xf32>
    %29 = arith.mulf %25, %24 : vector<8x32xf32>
    %30 = arith.addf %28, %29 : vector<8x32xf32>
    %31 = math.tanh %30 : vector<8x32xf32>
    %32 = arith.mulf %27, %31 : vector<8x32xf32>
    %c1_i32 = arith.constant 1 : i32
    %c8_i32_13 = arith.constant 8 : i32
    %33 = arith.muli %c1_i32, %c8_i32_13 : i32
    %34 = tpu.assume_multiple %33, 8 : i32
    %35 = arith.index_cast %34 : i32 to index
    %c0_14 = arith.constant 0 : index
    %36 = vector.load %arg4[%35, %c0_14] : memref<64x128xf32, #tpu.memory_space<vmem>>, vector<8x128xf32>
    %cst_15 = arith.constant dense<0.000000e+00> : vector<8x128xf32>
    %37 = tpu.matmul %32, %1, %cst_15 {dimension_numbers = #tpu.dot_dimension_numbers<[1], [0], [0], [1], [0, 0, 1, 1], [], []>} : vector<8x32xf32>, vector<32x128xf32>, vector<8x128xf32> -> vector<8x128xf32>
    %38 = arith.addf %36, %37 : vector<8x128xf32>
    %39 = vector.extract_strided_slice %38 {offsets = [0, 0], sizes = [8, 96], strides = [1, 1]} : vector<8x128xf32> to vector<8x96xf32>
    %40 = arith.negf %39 : vector<8x96xf32>
    %41 = math.exp %40 : vector<8x96xf32>
    %cst_16 = arith.constant 1.000000e+00 : f32
    %42 = vector.broadcast %cst_16 : f32 to vector<8x96xf32>
    %43 = arith.addf %42, %41 : vector<8x96xf32>
    %44 = arith.divf %42, %43 : vector<8x96xf32>
    %45 = vector.extract_strided_slice %38 {offsets = [0, 96], sizes = [8, 32], strides = [1, 1]} : vector<8x128xf32> to vector<8x32xf32>
    %46 = math.tanh %45 : vector<8x32xf32>
    %47 = vector.extract_strided_slice %44 {offsets = [0, 0], sizes = [8, 32], strides = [1, 1]} : vector<8x96xf32> to vector<8x32xf32>
    %48 = vector.extract_strided_slice %44 {offsets = [0, 32], sizes = [8, 32], strides = [1, 1]} : vector<8x96xf32> to vector<8x32xf32>
    %49 = vector.extract_strided_slice %44 {offsets = [0, 64], sizes = [8, 32], strides = [1, 1]} : vector<8x96xf32> to vector<8x32xf32>
    %50 = arith.mulf %48, %30 : vector<8x32xf32>
    %51 = arith.mulf %47, %46 : vector<8x32xf32>
    %52 = arith.addf %50, %51 : vector<8x32xf32>
    %53 = math.tanh %52 : vector<8x32xf32>
    %54 = arith.mulf %49, %53 : vector<8x32xf32>
    %c2_i32 = arith.constant 2 : i32
    %c8_i32_17 = arith.constant 8 : i32
    %55 = arith.muli %c2_i32, %c8_i32_17 : i32
    %56 = tpu.assume_multiple %55, 8 : i32
    %57 = arith.index_cast %56 : i32 to index
    %c0_18 = arith.constant 0 : index
    %58 = vector.load %arg4[%57, %c0_18] : memref<64x128xf32, #tpu.memory_space<vmem>>, vector<8x128xf32>
    %cst_19 = arith.constant dense<0.000000e+00> : vector<8x128xf32>
    %59 = tpu.matmul %54, %1, %cst_19 {dimension_numbers = #tpu.dot_dimension_numbers<[1], [0], [0], [1], [0, 0, 1, 1], [], []>} : vector<8x32xf32>, vector<32x128xf32>, vector<8x128xf32> -> vector<8x128xf32>
    %60 = arith.addf %58, %59 : vector<8x128xf32>
    %61 = vector.extract_strided_slice %60 {offsets = [0, 0], sizes = [8, 96], strides = [1, 1]} : vector<8x128xf32> to vector<8x96xf32>
    %62 = arith.negf %61 : vector<8x96xf32>
    %63 = math.exp %62 : vector<8x96xf32>
    %cst_20 = arith.constant 1.000000e+00 : f32
    %64 = vector.broadcast %cst_20 : f32 to vector<8x96xf32>
    %65 = arith.addf %64, %63 : vector<8x96xf32>
    %66 = arith.divf %64, %65 : vector<8x96xf32>
    %67 = vector.extract_strided_slice %60 {offsets = [0, 96], sizes = [8, 32], strides = [1, 1]} : vector<8x128xf32> to vector<8x32xf32>
    %68 = math.tanh %67 : vector<8x32xf32>
    %69 = vector.extract_strided_slice %66 {offsets = [0, 0], sizes = [8, 32], strides = [1, 1]} : vector<8x96xf32> to vector<8x32xf32>
    %70 = vector.extract_strided_slice %66 {offsets = [0, 32], sizes = [8, 32], strides = [1, 1]} : vector<8x96xf32> to vector<8x32xf32>
    %71 = vector.extract_strided_slice %66 {offsets = [0, 64], sizes = [8, 32], strides = [1, 1]} : vector<8x96xf32> to vector<8x32xf32>
    %72 = arith.mulf %70, %52 : vector<8x32xf32>
    %73 = arith.mulf %69, %68 : vector<8x32xf32>
    %74 = arith.addf %72, %73 : vector<8x32xf32>
    %75 = math.tanh %74 : vector<8x32xf32>
    %76 = arith.mulf %71, %75 : vector<8x32xf32>
    %c3_i32 = arith.constant 3 : i32
    %c8_i32_21 = arith.constant 8 : i32
    %77 = arith.muli %c3_i32, %c8_i32_21 : i32
    %78 = tpu.assume_multiple %77, 8 : i32
    %79 = arith.index_cast %78 : i32 to index
    %c0_22 = arith.constant 0 : index
    %80 = vector.load %arg4[%79, %c0_22] : memref<64x128xf32, #tpu.memory_space<vmem>>, vector<8x128xf32>
    %cst_23 = arith.constant dense<0.000000e+00> : vector<8x128xf32>
    %81 = tpu.matmul %76, %1, %cst_23 {dimension_numbers = #tpu.dot_dimension_numbers<[1], [0], [0], [1], [0, 0, 1, 1], [], []>} : vector<8x32xf32>, vector<32x128xf32>, vector<8x128xf32> -> vector<8x128xf32>
    %82 = arith.addf %80, %81 : vector<8x128xf32>
    %83 = vector.extract_strided_slice %82 {offsets = [0, 0], sizes = [8, 96], strides = [1, 1]} : vector<8x128xf32> to vector<8x96xf32>
    %84 = arith.negf %83 : vector<8x96xf32>
    %85 = math.exp %84 : vector<8x96xf32>
    %cst_24 = arith.constant 1.000000e+00 : f32
    %86 = vector.broadcast %cst_24 : f32 to vector<8x96xf32>
    %87 = arith.addf %86, %85 : vector<8x96xf32>
    %88 = arith.divf %86, %87 : vector<8x96xf32>
    %89 = vector.extract_strided_slice %82 {offsets = [0, 96], sizes = [8, 32], strides = [1, 1]} : vector<8x128xf32> to vector<8x32xf32>
    %90 = math.tanh %89 : vector<8x32xf32>
    %91 = vector.extract_strided_slice %88 {offsets = [0, 0], sizes = [8, 32], strides = [1, 1]} : vector<8x96xf32> to vector<8x32xf32>
    %92 = vector.extract_strided_slice %88 {offsets = [0, 32], sizes = [8, 32], strides = [1, 1]} : vector<8x96xf32> to vector<8x32xf32>
    %93 = vector.extract_strided_slice %88 {offsets = [0, 64], sizes = [8, 32], strides = [1, 1]} : vector<8x96xf32> to vector<8x32xf32>
    %94 = arith.mulf %92, %74 : vector<8x32xf32>
    %95 = arith.mulf %91, %90 : vector<8x32xf32>
    %96 = arith.addf %94, %95 : vector<8x32xf32>
    %97 = math.tanh %96 : vector<8x32xf32>
    %98 = arith.mulf %93, %97 : vector<8x32xf32>
    %c4_i32 = arith.constant 4 : i32
    %c8_i32_25 = arith.constant 8 : i32
    %99 = arith.muli %c4_i32, %c8_i32_25 : i32
    %100 = tpu.assume_multiple %99, 8 : i32
    %101 = arith.index_cast %100 : i32 to index
    %c0_26 = arith.constant 0 : index
    %102 = vector.load %arg4[%101, %c0_26] : memref<64x128xf32, #tpu.memory_space<vmem>>, vector<8x128xf32>
    %cst_27 = arith.constant dense<0.000000e+00> : vector<8x128xf32>
    %103 = tpu.matmul %98, %1, %cst_27 {dimension_numbers = #tpu.dot_dimension_numbers<[1], [0], [0], [1], [0, 0, 1, 1], [], []>} : vector<8x32xf32>, vector<32x128xf32>, vector<8x128xf32> -> vector<8x128xf32>
    %104 = arith.addf %102, %103 : vector<8x128xf32>
    %105 = vector.extract_strided_slice %104 {offsets = [0, 0], sizes = [8, 96], strides = [1, 1]} : vector<8x128xf32> to vector<8x96xf32>
    %106 = arith.negf %105 : vector<8x96xf32>
    %107 = math.exp %106 : vector<8x96xf32>
    %cst_28 = arith.constant 1.000000e+00 : f32
    %108 = vector.broadcast %cst_28 : f32 to vector<8x96xf32>
    %109 = arith.addf %108, %107 : vector<8x96xf32>
    %110 = arith.divf %108, %109 : vector<8x96xf32>
    %111 = vector.extract_strided_slice %104 {offsets = [0, 96], sizes = [8, 32], strides = [1, 1]} : vector<8x128xf32> to vector<8x32xf32>
    %112 = math.tanh %111 : vector<8x32xf32>
    %113 = vector.extract_strided_slice %110 {offsets = [0, 0], sizes = [8, 32], strides = [1, 1]} : vector<8x96xf32> to vector<8x32xf32>
    %114 = vector.extract_strided_slice %110 {offsets = [0, 32], sizes = [8, 32], strides = [1, 1]} : vector<8x96xf32> to vector<8x32xf32>
    %115 = vector.extract_strided_slice %110 {offsets = [0, 64], sizes = [8, 32], strides = [1, 1]} : vector<8x96xf32> to vector<8x32xf32>
    %116 = arith.mulf %114, %96 : vector<8x32xf32>
    %117 = arith.mulf %113, %112 : vector<8x32xf32>
    %118 = arith.addf %116, %117 : vector<8x32xf32>
    %119 = math.tanh %118 : vector<8x32xf32>
    %120 = arith.mulf %115, %119 : vector<8x32xf32>
    %c5_i32 = arith.constant 5 : i32
    %c8_i32_29 = arith.constant 8 : i32
    %121 = arith.muli %c5_i32, %c8_i32_29 : i32
    %122 = tpu.assume_multiple %121, 8 : i32
    %123 = arith.index_cast %122 : i32 to index
    %c0_30 = arith.constant 0 : index
    %124 = vector.load %arg4[%123, %c0_30] : memref<64x128xf32, #tpu.memory_space<vmem>>, vector<8x128xf32>
    %cst_31 = arith.constant dense<0.000000e+00> : vector<8x128xf32>
    %125 = tpu.matmul %120, %1, %cst_31 {dimension_numbers = #tpu.dot_dimension_numbers<[1], [0], [0], [1], [0, 0, 1, 1], [], []>} : vector<8x32xf32>, vector<32x128xf32>, vector<8x128xf32> -> vector<8x128xf32>
    %126 = arith.addf %124, %125 : vector<8x128xf32>
    %127 = vector.extract_strided_slice %126 {offsets = [0, 0], sizes = [8, 96], strides = [1, 1]} : vector<8x128xf32> to vector<8x96xf32>
    %128 = arith.negf %127 : vector<8x96xf32>
    %129 = math.exp %128 : vector<8x96xf32>
    %cst_32 = arith.constant 1.000000e+00 : f32
    %130 = vector.broadcast %cst_32 : f32 to vector<8x96xf32>
    %131 = arith.addf %130, %129 : vector<8x96xf32>
    %132 = arith.divf %130, %131 : vector<8x96xf32>
    %133 = vector.extract_strided_slice %126 {offsets = [0, 96], sizes = [8, 32], strides = [1, 1]} : vector<8x128xf32> to vector<8x32xf32>
    %134 = math.tanh %133 : vector<8x32xf32>
    %135 = vector.extract_strided_slice %132 {offsets = [0, 0], sizes = [8, 32], strides = [1, 1]} : vector<8x96xf32> to vector<8x32xf32>
    %136 = vector.extract_strided_slice %132 {offsets = [0, 32], sizes = [8, 32], strides = [1, 1]} : vector<8x96xf32> to vector<8x32xf32>
    %137 = vector.extract_strided_slice %132 {offsets = [0, 64], sizes = [8, 32], strides = [1, 1]} : vector<8x96xf32> to vector<8x32xf32>
    %138 = arith.mulf %136, %118 : vector<8x32xf32>
    %139 = arith.mulf %135, %134 : vector<8x32xf32>
    %140 = arith.addf %138, %139 : vector<8x32xf32>
    %141 = math.tanh %140 : vector<8x32xf32>
    %142 = arith.mulf %137, %141 : vector<8x32xf32>
    %c6_i32 = arith.constant 6 : i32
    %c8_i32_33 = arith.constant 8 : i32
    %143 = arith.muli %c6_i32, %c8_i32_33 : i32
    %144 = tpu.assume_multiple %143, 8 : i32
    %145 = arith.index_cast %144 : i32 to index
    %c0_34 = arith.constant 0 : index
    %146 = vector.load %arg4[%145, %c0_34] : memref<64x128xf32, #tpu.memory_space<vmem>>, vector<8x128xf32>
    %cst_35 = arith.constant dense<0.000000e+00> : vector<8x128xf32>
    %147 = tpu.matmul %142, %1, %cst_35 {dimension_numbers = #tpu.dot_dimension_numbers<[1], [0], [0], [1], [0, 0, 1, 1], [], []>} : vector<8x32xf32>, vector<32x128xf32>, vector<8x128xf32> -> vector<8x128xf32>
    %148 = arith.addf %146, %147 : vector<8x128xf32>
    %149 = vector.extract_strided_slice %148 {offsets = [0, 0], sizes = [8, 96], strides = [1, 1]} : vector<8x128xf32> to vector<8x96xf32>
    %150 = arith.negf %149 : vector<8x96xf32>
    %151 = math.exp %150 : vector<8x96xf32>
    %cst_36 = arith.constant 1.000000e+00 : f32
    %152 = vector.broadcast %cst_36 : f32 to vector<8x96xf32>
    %153 = arith.addf %152, %151 : vector<8x96xf32>
    %154 = arith.divf %152, %153 : vector<8x96xf32>
    %155 = vector.extract_strided_slice %148 {offsets = [0, 96], sizes = [8, 32], strides = [1, 1]} : vector<8x128xf32> to vector<8x32xf32>
    %156 = math.tanh %155 : vector<8x32xf32>
    %157 = vector.extract_strided_slice %154 {offsets = [0, 0], sizes = [8, 32], strides = [1, 1]} : vector<8x96xf32> to vector<8x32xf32>
    %158 = vector.extract_strided_slice %154 {offsets = [0, 32], sizes = [8, 32], strides = [1, 1]} : vector<8x96xf32> to vector<8x32xf32>
    %159 = vector.extract_strided_slice %154 {offsets = [0, 64], sizes = [8, 32], strides = [1, 1]} : vector<8x96xf32> to vector<8x32xf32>
    %160 = arith.mulf %158, %140 : vector<8x32xf32>
    %161 = arith.mulf %157, %156 : vector<8x32xf32>
    %162 = arith.addf %160, %161 : vector<8x32xf32>
    %163 = math.tanh %162 : vector<8x32xf32>
    %164 = arith.mulf %159, %163 : vector<8x32xf32>
    %c7_i32 = arith.constant 7 : i32
    %c8_i32_37 = arith.constant 8 : i32
    %165 = arith.muli %c7_i32, %c8_i32_37 : i32
    %166 = tpu.assume_multiple %165, 8 : i32
    %167 = arith.index_cast %166 : i32 to index
    %c0_38 = arith.constant 0 : index
    %168 = vector.load %arg4[%167, %c0_38] : memref<64x128xf32, #tpu.memory_space<vmem>>, vector<8x128xf32>
    %cst_39 = arith.constant dense<0.000000e+00> : vector<8x128xf32>
    %169 = tpu.matmul %164, %1, %cst_39 {dimension_numbers = #tpu.dot_dimension_numbers<[1], [0], [0], [1], [0, 0, 1, 1], [], []>} : vector<8x32xf32>, vector<32x128xf32>, vector<8x128xf32> -> vector<8x128xf32>
    %170 = arith.addf %168, %169 : vector<8x128xf32>
    %171 = vector.extract_strided_slice %170 {offsets = [0, 0], sizes = [8, 96], strides = [1, 1]} : vector<8x128xf32> to vector<8x96xf32>
    %172 = arith.negf %171 : vector<8x96xf32>
    %173 = math.exp %172 : vector<8x96xf32>
    %cst_40 = arith.constant 1.000000e+00 : f32
    %174 = vector.broadcast %cst_40 : f32 to vector<8x96xf32>
    %175 = arith.addf %174, %173 : vector<8x96xf32>
    %176 = arith.divf %174, %175 : vector<8x96xf32>
    %177 = vector.extract_strided_slice %170 {offsets = [0, 96], sizes = [8, 32], strides = [1, 1]} : vector<8x128xf32> to vector<8x32xf32>
    %178 = math.tanh %177 : vector<8x32xf32>
    %179 = vector.extract_strided_slice %176 {offsets = [0, 0], sizes = [8, 32], strides = [1, 1]} : vector<8x96xf32> to vector<8x32xf32>
    %180 = vector.extract_strided_slice %176 {offsets = [0, 32], sizes = [8, 32], strides = [1, 1]} : vector<8x96xf32> to vector<8x32xf32>
    %181 = vector.extract_strided_slice %176 {offsets = [0, 64], sizes = [8, 32], strides = [1, 1]} : vector<8x96xf32> to vector<8x32xf32>
    %182 = arith.mulf %180, %162 : vector<8x32xf32>
    %183 = arith.mulf %179, %178 : vector<8x32xf32>
    %184 = arith.addf %182, %183 : vector<8x32xf32>
    %185 = math.tanh %184 : vector<8x32xf32>
    %186 = arith.mulf %181, %185 : vector<8x32xf32>
    %c8_i32_41 = arith.constant 8 : i32
    %c56 = arith.constant 56 : index
    %c0_42 = arith.constant 0 : index
    %187 = vector.load %arg2[%c56, %c0_42] : memref<136x128xf32, #tpu.memory_space<vmem>>, vector<32x128xf32>
    %c88 = arith.constant 88 : index
    %c0_43 = arith.constant 0 : index
    %188 = vector.load %arg2[%c88, %c0_43] : memref<136x128xf32, #tpu.memory_space<vmem>>, vector<1x128xf32>
    %cst_44 = arith.constant dense<0.000000e+00> : vector<8x128xf32>
    %189 = tpu.matmul %186, %187, %cst_44 {dimension_numbers = #tpu.dot_dimension_numbers<[1], [0], [0], [1], [0, 0, 1, 1], [], []>} : vector<8x32xf32>, vector<32x128xf32>, vector<8x128xf32> -> vector<8x128xf32>
    %190 = vector.broadcast %188 : vector<1x128xf32> to vector<8x128xf32>
    %191 = arith.addf %189, %190 : vector<8x128xf32>
    %cst_45 = arith.constant 0.000000e+00 : f32
    %192 = vector.broadcast %cst_45 : f32 to vector<8x128xf32>
    %193 = arith.maximumf %191, %192 : vector<8x128xf32>
    %c96 = arith.constant 96 : index
    %c0_46 = arith.constant 0 : index
    %194 = vector.load %arg2[%c96, %c0_46] : memref<136x128xf32, #tpu.memory_space<vmem>>, vector<32x128xf32>
    %c128 = arith.constant 128 : index
    %c0_47 = arith.constant 0 : index
    %195 = vector.load %arg2[%c128, %c0_47] : memref<136x128xf32, #tpu.memory_space<vmem>>, vector<1x128xf32>
    %196 = vector.extract_strided_slice %193 {offsets = [0, 0], sizes = [8, 32], strides = [1, 1]} : vector<8x128xf32> to vector<8x32xf32>
    %cst_48 = arith.constant dense<0.000000e+00> : vector<8x128xf32>
    %197 = tpu.matmul %196, %194, %cst_48 {dimension_numbers = #tpu.dot_dimension_numbers<[1], [0], [0], [1], [0, 0, 1, 1], [], []>} : vector<8x32xf32>, vector<32x128xf32>, vector<8x128xf32> -> vector<8x128xf32>
    %198 = vector.broadcast %195 : vector<1x128xf32> to vector<8x128xf32>
    %199 = arith.addf %197, %198 : vector<8x128xf32>
    %cst_49 = arith.constant 0.000000e+00 : f32
    %200 = vector.broadcast %cst_49 : f32 to vector<8x128xf32>
    %201 = arith.maximumf %199, %200 : vector<8x128xf32>
    %202 = vector.extract_strided_slice %201 {offsets = [0, 0], sizes = [8, 1], strides = [1, 1]} : vector<8x128xf32> to vector<8x1xf32>
    %203 = vector.extract_strided_slice %201 {offsets = [0, 1], sizes = [8, 1], strides = [1, 1]} : vector<8x128xf32> to vector<8x1xf32>
    %204 = arith.subf %202, %203 : vector<8x1xf32>
    %205 = arith.negf %204 : vector<8x1xf32>
    %206 = math.exp %205 : vector<8x1xf32>
    %cst_50 = arith.constant 1.000000e+00 : f32
    %207 = vector.broadcast %cst_50 : f32 to vector<8x1xf32>
    %208 = arith.addf %207, %206 : vector<8x1xf32>
    %209 = arith.divf %207, %208 : vector<8x1xf32>
    %cst_51 = arith.constant 1.000000e+00 : f32
    %210 = vector.broadcast %cst_51 : f32 to vector<8x1xf32>
    %211 = arith.subf %210, %209 : vector<8x1xf32>
    %cst_52 = arith.constant 0.000000e+00 : f32
    %212 = vector.broadcast %cst_52 : f32 to vector<8x128xf32>
    %c0_53 = arith.constant 0 : index
    %c0_54 = arith.constant 0 : index
    %213 = vector.load %arg3[%c0_53, %c0_54] : memref<8x128xf32, #tpu.memory_space<vmem>>, vector<8x128xf32>
    tpu.vector_store %arg3[%c0_53, %c0_54], %212 {strides = array<i32>} : memref<8x128xf32, #tpu.memory_space<vmem>>, vector<8x128xf32>,
    %c0_55 = arith.constant 0 : index
    %c0_56 = arith.constant 0 : index
    %214 = vector.load %arg3[%c0_55, %c0_56] : memref<8x128xf32, #tpu.memory_space<vmem>>, vector<8x32xf32>
    tpu.vector_store %arg3[%c0_55, %c0_56], %186 {strides = array<i32>} : memref<8x128xf32, #tpu.memory_space<vmem>>, vector<8x32xf32>,
    %215 = vector.extract_strided_slice %193 {offsets = [0, 0], sizes = [8, 32], strides = [1, 1]} : vector<8x128xf32> to vector<8x32xf32>
    %c0_57 = arith.constant 0 : index
    %c32 = arith.constant 32 : index
    %216 = vector.load %arg3[%c0_57, %c32] : memref<8x128xf32, #tpu.memory_space<vmem>>, vector<8x32xf32>
    tpu.vector_store %arg3[%c0_57, %c32], %215 {strides = array<i32>} : memref<8x128xf32, #tpu.memory_space<vmem>>, vector<8x32xf32>,
    %c0_58 = arith.constant 0 : index
    %c64 = arith.constant 64 : index
    %217 = vector.load %arg3[%c0_58, %c64] : memref<8x128xf32, #tpu.memory_space<vmem>>, vector<8x1xf32>
    tpu.vector_store %arg3[%c0_58, %c64], %209 {strides = array<i32>} : memref<8x128xf32, #tpu.memory_space<vmem>>, vector<8x1xf32>,
    %c0_59 = arith.constant 0 : index
    %c65 = arith.constant 65 : index
    %218 = vector.load %arg3[%c0_59, %c65] : memref<8x128xf32, #tpu.memory_space<vmem>>, vector<8x1xf32>
    tpu.vector_store %arg3[%c0_59, %c65], %211 {strides = array<i32>} : memref<8x128xf32, #tpu.memory_space<vmem>>, vector<8x1xf32>,
    return
  }
  func.func @transform_0(%arg0: i32) -> (i32, i32, i32) {
    %c0_i32 = arith.constant 0 : i32
    %c0_i32_0 = arith.constant 0 : i32
    %c0_i32_1 = arith.constant 0 : i32
    return %arg0, %c0_i32, %c0_i32_0 : i32, i32, i32
  }
  func.func @transform_1(%arg0: i32) -> (i32, i32) {
    %c0_i32 = arith.constant 0 : i32
    %c0_i32_0 = arith.constant 0 : i32
    %c0_i32_1 = arith.constant 0 : i32
    return %c0_i32, %c0_i32_0 : i32, i32
  }
  func.func @transform_2(%arg0: i32) -> (i32, i32) {
    %c0_i32 = arith.constant 0 : i32
    %c0_i32_0 = arith.constant 0 : i32
    return %arg0, %c0_i32 : i32, i32
  }
}

</mosaic_0001>

<bundles_post_ra>
// kernel: decision_net_forward.1
= control target key start
LH: loop header
LB: loop body
LE: loop exit
PB: predicated region body
PF: predicated region fallthrough
CT: control target
= control target key end

     0   :  { %s1703_s9 = smov 0   ;;  %s1968_s0 = inlined_call_operand.vmem [shape: f32[2,64,16], index: 0, kind: input, shape index: {}]   ;;  %s1969_s1 = inlined_call_operand.vmem [shape: f32[136,128], index: 1, kind: input, shape index: {}]   ;;  %s1970_s2 = inlined_call_operand.vmem [shape: f32[16,128], index: 2, kind: output, shape index: {}]  }
   0x1 LB: > { %s1366_s10 = sadd.s32 4294967295, %s1680_s9   ;;  %p1370_p0 = scmp.ge.s32.totalorder %s1680_s9, 1  ;;  %s1680_s9 = sphi %s1703_s9, %s12_s9  }
   0x2   : > { %p112_p1 = scmp.lt.s32.totalorder %s1680_s9, 3 }
   0x4   : > { %p113_p2 = pnand %p1370_p0, %p112_p1 }
   0x5   : > { %p133_p3 = scmp.lt.s32.totalorder (!%p113_p2), %s1366_s10, 1  ;;  %s1684_s29 = smov (!%p113_p2), 32  }
   0x6   : > { %116 = sbr.rel (%p113_p2) target bundleno = 6196 (0x1834), region = 28  ;;  %s1685_s30 = smov (!%p113_p2), 64  }
   0x7   : > { %s1686_s28 = smov (!%p113_p2), 127  }
   0xb   : > { %v1714_v0 = vld [vmem:[%s1969_s1 + $0x28] sm:$0xff]  ;;  %v1682_v2 = vmov 0.0   ;;  %v1723_v3 = vld [vmem:[%s1969_s1 + $0x20] sm:$0xff]  ;;  %s1972_s10 = smov (!%p133_p3, %s1366_s10), 1  ;;  %v1735_v5 = vld [vmem:[%s1969_s1 + $0x18] sm:$0xff]  ;;  %vm161_vm0 = vcmask 130048  }
   0xc   : > { %v143_v1 = vld [vmem:[%s1969_s1 + $0x8] sm:$0xff]  ;;  %1482 = vmatprep.subr.mxu1 %v1682_v2  ;;  %v142_v4 = vld [vmem:[%s1969_s1] sm:$0xff]  ;;  %s1405_s21 = sshll.u32 %s1972_s10, 6  ;;  %v1748_v6 = vld [vmem:[%s1969_s1 + $0x10] sm:$0xff]  ;;  %vm1683_vm1 = vmmov 0   ;;  %vm300_vm2 = vcmask 261120  }
   0xd   : > { %1466 = vmatprep.subr.mxu0 %v143_v1  ;;  %1483 = vmatpush3.msra.mxu1 %v1714_v0  ;;  %s1743_s24 = scalar_lea.vmem %s1968_s0, %s1405_s21  ;;  %v1783_v11 = vld [vmem:[%s1969_s1 + $0x30] ss:$0 sm:$0xff]  ;;  %s1373_s7 = sshll.u32 %s1972_s10, 3  ;;  %vm1299_vm3 = vcmask 523520   ;;  %vm1305_vm4 = vcmask 531968   ;;  %vm1311_vm5 = vcmask 540168  }
   0xe   : > { %1467 = vmatpush3.msra.mxu0 %v143_v1  ;;  %1484 = vmatprep.subr.mxu1 %v1682_v2  ;;  %v149_v7 = vld [vmem:[%s1743_s24] sm:$0xff]  ;;  %v150_v8 = vld [vmem:[%s1743_s24 + $0x8] sm:$0xff]  ;;  %v151_v44 = vld [vmem:[%s1743_s24 + $0x10] sm:$0xff]  ;;  %s1920_s12 = scalar_lea.vmem %s1970_s2, %s1373_s7 }
   0xf   : > { %1468 = vmatprep.subr.mxu0 %v142_v4  ;;  %1485 = vmatpush3.msra.mxu1 %v1723_v3  ;;  %v152_v45 = vld [vmem:[%s1743_s24 + $0x18] sm:$0xff]  ;;  %v153_v46 = vld [vmem:[%s1743_s24 + $0x20] sm:$0xff]  ;;  %v154_v47 = vld [vmem:[%s1743_s24 + $0x28] sm:$0xff]  ;;  %1293 = vst [vmem:[%s1920_s12] sm:$0xff] %v1682_v2 }
  0x10   : > { %1469 = vmatpush3.msra.mxu0 %v142_v4  ;;  %1486 = vmatprep.subr.mxu1 %v1682_v2  ;;  %v155_v48 = vld [vmem:[%s1743_s24 + $0x30] sm:$0xff]  ;;  %v156_v49 = vld [vmem:[%s1743_s24 + $0x38] sm:$0xff] }
  0x11   : > { %1490 = vmatprep.mubr.msk.f32.mxu1 %vm1683_vm1, %v1682_v2  ;;  %1487 = vmatpush3.msra.mxu1 %v1735_v5 }
  0x12   : > { %1504 = vmatprep.subr.mxu0 %v1682_v2  ;;  %1470 = vmatprep.mubr.msk.f32.mxu0 %vm161_vm0, %v149_v7 }
  0x13   : > { %1488 = vmatprep.subr.mxu1 %v1682_v2  ;;  %1471 = vmatmul.mubr.msk.f32.vlgmr.msra.gmra.mxu0 %vm161_vm0, %v150_v8 }
  0x14   : > { %1489 = vmatpush3.msra.mxu1 %v1748_v6  ;;  %1505 = vmatpush3.msra.mxu0 %v1714_v0 }
  0x15   : > { %1491 = vmatmul.mubr.f32.vlgmr.msra.gmra.mxu1 %v1682_v2  ;;  %1493 = vmatprep.subr.mxu1 %v1682_v2 }
  0x16   : > { %1494 = vmatpush3.msra.mxu1 %v1714_v0  ;;  %1501 = vmatprep.mubr.msk.f32.mxu1 %vm1683_vm1, %v1682_v2 }
  0x17   : > { %1495 = vmatprep.subr.mxu1 %v1682_v2  ;;  %1506 = vmatprep.subr.mxu0 %v1682_v2 }
  0x18   : > { %1496 = vmatpush3.msra.mxu1 %v1723_v3  ;;  %1507 = vmatpush3.msra.mxu0 %v1723_v3 }
  0x19   : > { %1497 = vmatprep.subr.mxu1 %v1682_v2  ;;  %1508 = vmatprep.subr.mxu0 %v1682_v2 }
  0x1a   : > { %1498 = vmatpush3.msra.mxu1 %v1735_v5  ;;  %1509 = vmatpush3.msra.mxu0 %v1735_v5 }
  0x1b   : > { %1499 = vmatprep.subr.mxu1 %v1682_v2  ;;  %1510 = vmatprep.subr.mxu0 %v1682_v2 }
  0x1c   : > { %1500 = vmatpush3.msra.mxu1 %v1748_v6  ;;  %1511 = vmatpush3.msra.mxu0 %v1748_v6 }
  0x1d   : > { %1515 = vmatprep.subr.mxu1 %v1682_v2  ;;  %1526 = vmatprep.subr.mxu0 %v1682_v2 }
  0x1e   : > { %1473 = vmatprep.mubr.msk.f32.mxu0 %vm161_vm0, %v151_v44 }
  0x1f   : > { %1474 = vmatmul.mubr.msk.f32.gmra.mxu0 %vm161_vm0, %v152_v45 }
  0x20   : > { %1476 = vmatprep.mubr.msk.f32.mxu0 %vm161_vm0, %v153_v46 }
  0x23   : > { %1477 = vmatmul.mubr.msk.f32.gmra.mxu0 %vm161_vm0, %v154_v47 }
  0x24   : > { %1479 = vmatprep.mubr.msk.f32.mxu0 %vm161_vm0, %v155_v48 }
  0x27   : > { %1480 = vmatmul.mubr.msk.f32.gmra.mxu0 %vm161_vm0, %v156_v49 }
  0x28   : > { %1512 = vmatprep.mubr.msk.f32.mxu0 %vm1683_vm1, %v1682_v2 }
  0xd3   : > { %v1472_v9 = vpop.f32.mrf.mxu0 }
  0xd4   : > { %v258_v30 = vadd.f32 %v1472_v9, %v1783_v11 }
  0xd5   : > { %v370_v10 = vpop.f32.mrf.mxu1  ;;  %v252_v12 = vpop.f32.mrf.mxu0 }
  0xd6   : > { %v253_v13 = vadd.f32 %v1783_v11, %v252_v12 }
  0xd7   : > { %v1492_v14 = vpop.f32.mrf.mxu1 }
  0xd8   : > { %v374_v15 = vadd.f32 %v370_v10, %v253_v13 }
  0xda   : > { %1606 = vtanh.f32 %v374_v15  ;;  %v1383_v17 = vmul.f32 -1.442695, %v374_v15 }
  0xdc   : > { %1608 = vpow2.f32 %v1383_v17 }
  0xdf   : > { %v1475_v54 = vpop.f32.mrf.mxu0 }
  0xe1   : > { %v262_v55 = vpop.f32.mrf.mxu0 }
  0xe2   : > { %v263_v60 = vadd.f32 %v1783_v11, %v262_v55 }
  0xe3   : > { %v1831_v56 = vpop.f32.mrf.mxu0 }
  0xe5   : > { %v1833_v57 = vpop.f32.mrf.mxu0 }
  0xe7   : > { %v1607_v16 = vpop.eup %1606  ;;  %v1835_v58 = vpop.f32.mrf.mxu0 }
  0xe8   : > { %384 = vrot.lane.b32.xlu0 %v1607_v16, %s1684_s29 }
  0xe9   : > { %v1609_v18 = vpop.eup %1608  ;;  %v1837_v59 = vpop.f32.mrf.mxu0 }
  0xea   : > { %v378_v19 = vadd.f32 1.0, %v1609_v18 }
  0xec   : > { %1610 = vrcp.f32 %v378_v19 }
  0xf9   : > { %v1611_v20 = vpop.eup %1610 }
  0xfa   : > { %v382_v23 = vmul.f32 0.0, %v1611_v20 }
 0x15a   : > { %v385_v21 = vpop.permute.xlu0 %384 }
 0x15b   : > { %v387_v22 = vmul.f32 %v1611_v20, %v385_v21 }
 0x15d   : > { %389 = vrot.lane.b32.xlu0 %v387_v22, %s1684_s29 }
 0x1cf   : > { %v390_v24 = vpop.permute.xlu0 %389 }
 0x1d0   : > { %v392_v25 = vadd.f32 %v390_v24, %v382_v23 }
 0x1d2   : > { %1612 = vtanh.f32 %v392_v25 }
 0x1df   : > { %v1613_v26 = vpop.eup %1612 }
 0x1e0   : > { %395 = vrot.lane.b32.xlu1 %v1613_v26, %s1684_s29 }
 0x252   : > { %v396_v27 = vpop.permute.xlu1 %395 }
 0x253   : > { %v398_v28 = vmul.f32 %v1611_v20, %v396_v27  ;;  %v268_v20 = vadd.f32 %v1475_v54, %v1783_v11 }
 0x255   : > { %402 = vrot.lane.b32.xlu1 %v398_v28, %s1685_s30 }
 0x2c7   : > { %v403_v29 = vpop.permute.xlu1 %402 }
 0x2c8   : > { %1502 = vmatmul.mubr.msk.f32.vlgmr.msra.gmra.mxu1 %vm300_vm2, %v403_v29 }
 0x2c9   : > { %1516 = vmatpush3.msra.mxu1 %v1714_v0  ;;  %1523 = vmatprep.mubr.msk.f32.mxu1 %vm1683_vm1, %v1682_v2 }
 0x2ca   : > { %1517 = vmatprep.subr.mxu1 %v1682_v2 }
 0x2cb   : > { %1518 = vmatpush3.msra.mxu1 %v1723_v3 }
 0x2cc   : > { %1519 = vmatprep.subr.mxu1 %v1682_v2 }
 0x2cd   : > { %1520 = vmatpush3.msra.mxu1 %v1735_v5 }
 0x2ce   : > { %1521 = vmatprep.subr.mxu1 %v1682_v2 }
 0x2cf   : > { %1522 = vmatpush3.msra.mxu1 %v1748_v6 }
 0x2d0   : > { %1537 = vmatprep.subr.mxu1 %v1682_v2 }
 0x388   : > { %v472_v31 = vpop.f32.mrf.mxu1 }
 0x389   : > { %v476_v32 = vadd.f32 %v472_v31, %v258_v30 }
 0x38a   : > { %v1503_v33 = vpop.f32.mrf.mxu1 }
 0x38b   : > { %1614 = vtanh.f32 %v476_v32  ;;  %v1385_v35 = vmul.f32 -1.442695, %v476_v32 }
 0x38d   : > { %1616 = vpow2.f32 %v1385_v35 }
 0x398   : > { %v1615_v34 = vpop.eup %1614 }
 0x399   : > { %486 = vrot.lane.b32.xlu0 %v1615_v34, %s1684_s29 }
 0x39a   : > { %v1617_v36 = vpop.eup %1616 }
 0x39b   : > { %v480_v37 = vadd.f32 1.0, %v1617_v36 }
 0x39d   : > { %1618 = vrcp.f32 %v480_v37 }
 0x3aa   : > { %v1619_v38 = vpop.eup %1618 }
 0x3ab   : > { %v484_v41 = vmul.f32 %v1619_v38, %v392_v25 }
 0x40b   : > { %v487_v39 = vpop.permute.xlu0 %486 }
 0x40c   : > { %v489_v40 = vmul.f32 %v1619_v38, %v487_v39 }
 0x40e   : > { %491 = vrot.lane.b32.xlu1 %v489_v40, %s1684_s29 }
 0x480   : > { %v492_v42 = vpop.permute.xlu1 %491 }
 0x481   : > { %v494_v43 = vadd.f32 %v492_v42, %v484_v41 }
 0x483   : > { %1620 = vtanh.f32 %v494_v43 }
 0x490   : > { %v1621_v50 = vpop.eup %1620 }
 0x491   : > { %497 = vrot.lane.b32.xlu0 %v1621_v50, %s1684_s29 }
 0x503   : > { %v498_v51 = vpop.permute.xlu0 %497 }
 0x504   : > { %v500_v52 = vmul.f32 %v1619_v38, %v498_v51  ;;  %v273_v38 = vadd.f32 %v1783_v11, %v1833_v57 }
 0x506   : > { %504 = vrot.lane.b32.xlu1 %v500_v52, %s1685_s30 }
 0x578   : > { %v505_v53 = vpop.permute.xlu1 %504 }
 0x579   : > { %1513 = vmatmul.mubr.msk.f32.vlgmr.msra.gmra.mxu0 %vm300_vm2, %v505_v53 }
 0x57a   : > { %1527 = vmatpush3.msra.mxu0 %v1714_v0  ;;  %1534 = vmatprep.mubr.msk.f32.mxu0 %vm1683_vm1, %v1682_v2 }
 0x57b   : > { %1528 = vmatprep.subr.mxu0 %v1682_v2 }
 0x57c   : > { %1529 = vmatpush3.msra.mxu0 %v1723_v3 }
 0x57d   : > { %1530 = vmatprep.subr.mxu0 %v1682_v2 }
 0x57e   : > { %1531 = vmatpush3.msra.mxu0 %v1735_v5 }
 0x57f   : > { %1532 = vmatprep.subr.mxu0 %v1682_v2 }
 0x580   : > { %1533 = vmatpush3.msra.mxu0 %v1748_v6 }
 0x581   : > { %1548 = vmatprep.subr.mxu0 %v1682_v2 }
 0x639   : > { %v574_v61 = vpop.f32.mrf.mxu0 }
 0x63a   : > { %v578_v62 = vadd.f32 %v574_v61, %v263_v60 }
 0x63b   : > { %v1514_v63 = vpop.f32.mrf.mxu0 }
 0x63c   : > { %1622 = vtanh.f32 %v578_v62  ;;  %v1387_v4 = vmul.f32 -1.442695, %v578_v62 }
 0x63e   : > { %1624 = vpow2.f32 %v1387_v4 }
 0x649   : > { %v1623_v1 = vpop.eup %1622 }
 0x64a   : > { %588 = vrot.lane.b32.xlu0 %v1623_v1, %s1684_s29 }
 0x64b   : > { %v1625_v7 = vpop.eup %1624 }
 0x64c   : > { %v582_v8 = vadd.f32 1.0, %v1625_v7 }
 0x64e   : > { %1626 = vrcp.f32 %v582_v8 }
 0x65b   : > { %v1627_v9 = vpop.eup %1626 }
 0x65c   : > { %v586_v13 = vmul.f32 %v1627_v9, %v494_v43 }
 0x6bc   : > { %v589_v10 = vpop.permute.xlu0 %588 }
 0x6bd   : > { %v591_v12 = vmul.f32 %v1627_v9, %v589_v10 }
 0x6bf   : > { %593 = vrot.lane.b32.xlu1 %v591_v12, %s1684_s29 }
 0x731   : > { %v594_v14 = vpop.permute.xlu1 %593 }
 0x732   : > { %v596_v15 = vadd.f32 %v594_v14, %v586_v13  ;;  %v283_v14 = vadd.f32 %v1783_v11, %v1837_v59 }
 0x734   : > { %1628 = vtanh.f32 %v596_v15 }
 0x741   : > { %v1629_v16 = vpop.eup %1628 }
 0x742   : > { %599 = vrot.lane.b32.xlu0 %v1629_v16, %s1684_s29 }
 0x7b4   : > { %v600_v17 = vpop.permute.xlu0 %599 }
 0x7b5   : > { %v602_v18 = vmul.f32 %v1627_v9, %v600_v17 }
 0x7b7   : > { %606 = vrot.lane.b32.xlu1 %v602_v18, %s1685_s30 }
 0x829   : > { %v607_v19 = vpop.permute.xlu1 %606 }
 0x82a   : > { %1524 = vmatmul.mubr.msk.f32.vlgmr.msra.gmra.mxu1 %vm300_vm2, %v607_v19 }
 0x82b   : > { %1538 = vmatpush3.msra.mxu1 %v1714_v0  ;;  %1545 = vmatprep.mubr.msk.f32.mxu1 %vm1683_vm1, %v1682_v2 }
 0x82c   : > { %1539 = vmatprep.subr.mxu1 %v1682_v2 }
 0x82d   : > { %1540 = vmatpush3.msra.mxu1 %v1723_v3 }
 0x82e   : > { %1541 = vmatprep.subr.mxu1 %v1682_v2 }
 0x82f   : > { %1542 = vmatpush3.msra.mxu1 %v1735_v5 }
 0x830   : > { %1543 = vmatprep.subr.mxu1 %v1682_v2 }
 0x831   : > { %1544 = vmatpush3.msra.mxu1 %v1748_v6 }
 0x832   : > { %1559 = vmatprep.subr.mxu1 %v1682_v2 }
 0x8ea   : > { %v676_v21 = vpop.f32.mrf.mxu1 }
 0x8eb   : > { %v680_v22 = vadd.f32 %v676_v21, %v268_v20 }
 0x8ec   : > { %v1525_v23 = vpop.f32.mrf.mxu1 }
 0x8ed   : > { %1630 = vtanh.f32 %v680_v22  ;;  %v1389_v25 = vmul.f32 -1.442695, %v680_v22 }
 0x8ef   : > { %1632 = vpow2.f32 %v1389_v25 }
 0x8fa   : > { %v1631_v24 = vpop.eup %1630 }
 0x8fb   : > { %690 = vrot.lane.b32.xlu0 %v1631_v24, %s1684_s29 }
 0x8fc   : > { %v1633_v26 = vpop.eup %1632 }
 0x8fd   : > { %v684_v27 = vadd.f32 1.0, %v1633_v26 }
 0x8ff   : > { %1634 = vrcp.f32 %v684_v27 }
 0x90c   : > { %v1635_v28 = vpop.eup %1634 }
 0x90d   : > { %v688_v31 = vmul.f32 %v1635_v28, %v596_v15 }
 0x96d   : > { %v691_v29 = vpop.permute.xlu0 %690 }
 0x96e   : > { %v693_v30 = vmul.f32 %v1635_v28, %v691_v29 }
 0x970   : > { %695 = vrot.lane.b32.xlu1 %v693_v30, %s1684_s29 }
 0x9e2   : > { %v696_v32 = vpop.permute.xlu1 %695 }
 0x9e3   : > { %v698_v33 = vadd.f32 %v696_v32, %v688_v31  ;;  %v288_v31 = vadd.f32 %v1835_v58, %v1783_v11 }
 0x9e5   : > { %1636 = vtanh.f32 %v698_v33 }
 0x9f2   : > { %v1637_v34 = vpop.eup %1636 }
 0x9f3   : > { %701 = vrot.lane.b32.xlu0 %v1637_v34, %s1684_s29 }
 0xa65   : > { %v702_v35 = vpop.permute.xlu0 %701 }
 0xa66   : > { %v704_v36 = vmul.f32 %v1635_v28, %v702_v35 }
 0xa68   : > { %708 = vrot.lane.b32.xlu1 %v704_v36, %s1685_s30 }
 0xada   : > { %v709_v37 = vpop.permute.xlu1 %708 }
 0xadb   : > { %1535 = vmatmul.mubr.msk.f32.vlgmr.msra.gmra.mxu0 %vm300_vm2, %v709_v37 }
 0xadc   : > { %1549 = vmatpush3.msra.mxu0 %v1714_v0  ;;  %1556 = vmatprep.mubr.msk.f32.mxu0 %vm1683_vm1, %v1682_v2 }
 0xadd   : > { %1550 = vmatprep.subr.mxu0 %v1682_v2 }
 0xade   : > { %1551 = vmatpush3.msra.mxu0 %v1723_v3 }
 0xadf   : > { %1552 = vmatprep.subr.mxu0 %v1682_v2 }
 0xae0   : > { %1553 = vmatpush3.msra.mxu0 %v1735_v5 }
 0xae1   : > { %1554 = vmatprep.subr.mxu0 %v1682_v2 }
 0xae2   : > { %1555 = vmatpush3.msra.mxu0 %v1748_v6 }
 0xae3   : > { %1570 = vmatprep.subr.mxu0 %v1682_v2 }
 0xb9b   : > { %v778_v39 = vpop.f32.mrf.mxu0 }
 0xb9c   : > { %v782_v40 = vadd.f32 %v778_v39, %v273_v38 }
 0xb9d   : > { %v1536_v41 = vpop.f32.mrf.mxu0 }
 0xb9e   : > { %1638 = vtanh.f32 %v782_v40  ;;  %v1391_v43 = vmul.f32 -1.442695, %v782_v40 }
 0xba0   : > { %1640 = vpow2.f32 %v1391_v43  ;;  %v1116_v43 = vld [vmem:[%s1969_s1 + $0x50] sm:$0xff] }
 0xbab   : > { %v1639_v42 = vpop.eup %1638 }
 0xbac   : > { %792 = vrot.lane.b32.xlu0 %v1639_v42, %s1684_s29 }
 0xbad   : > { %v1641_v44 = vpop.eup %1640 }
 0xbae   : > { %v786_v45 = vadd.f32 1.0, %v1641_v44  ;;  %v1115_v44 = vld [vmem:[%s1969_s1 + $0x48] sm:$0xff] }
 0xbb0   : > { %1642 = vrcp.f32 %v786_v45  ;;  %v1114_v45 = vld [vmem:[%s1969_s1 + $0x40] sm:$0xff] }
 0xbbd   : > { %v1643_v46 = vpop.eup %1642 }
 0xbbe   : > { %v790_v49 = vmul.f32 %v1643_v46, %v698_v33 }
 0xc1e   : > { %v793_v47 = vpop.permute.xlu0 %792 }
 0xc1f   : > { %v795_v48 = vmul.f32 %v1643_v46, %v793_v47 }
 0xc21   : > { %797 = vrot.lane.b32.xlu1 %v795_v48, %s1684_s29  ;;  %v1201_v48 = vld [vmem:[%s1969_s1 + $0x78] sm:$0xff] }
 0xc93   : > { %v798_v50 = vpop.permute.xlu1 %797 }
 0xc94   : > { %v800_v51 = vadd.f32 %v798_v50, %v790_v49 }
 0xc96   : > { %1644 = vtanh.f32 %v800_v51 }
 0xca3   : > { %v1645_v52 = vpop.eup %1644 }
 0xca4   : > { %803 = vrot.lane.b32.xlu0 %v1645_v52, %s1684_s29  ;;  %v1200_v52 = vld [vmem:[%s1969_s1 + $0x70] sm:$0xff] }
 0xd16   : > { %v804_v53 = vpop.permute.xlu0 %803 }
 0xd17   : > { %v806_v54 = vmul.f32 %v1643_v46, %v804_v53  ;;  %v1113_v46 = vld [vmem:[%s1969_s1 + $0x38] sm:$0xff]  ;;  %v1199_v53 = vld [vmem:[%s1969_s1 + $0x68] sm:$0xff] }
 0xd19   : > { %810 = vrot.lane.b32.xlu1 %v806_v54, %s1685_s30  ;;  %v1198_v54 = vld [vmem:[%s1969_s1 + $0x60] sm:$0xff] }
 0xd8b   : > { %v811_v55 = vpop.permute.xlu1 %810 }
 0xd8c   : > { %1546 = vmatmul.mubr.msk.f32.vlgmr.msra.gmra.mxu1 %vm300_vm2, %v811_v55  ;;  %v1398_v55 = vld [vmem:[%s1969_s1 + $0x58] ss:$0 sm:$0xff] }
 0xd8d   : > { %1560 = vmatpush3.msra.mxu1 %v1714_v0  ;;  %1567 = vmatprep.mubr.msk.f32.mxu1 %vm1683_vm1, %v1682_v2  ;;  %v278_v0 = vadd.f32 %v1831_v56, %v1783_v11 }
 0xd8e   : > { %1561 = vmatprep.subr.mxu1 %v1682_v2 }
 0xd8f   : > { %1562 = vmatpush3.msra.mxu1 %v1723_v3 }
 0xd90   : > { %1563 = vmatprep.subr.mxu1 %v1682_v2 }
 0xd91   : > { %1564 = vmatpush3.msra.mxu1 %v1735_v5 }
 0xd92   : > { %1565 = vmatprep.subr.mxu1 %v1682_v2 }
 0xd93   : > { %1566 = vmatpush3.msra.mxu1 %v1748_v6 }
 0xd94   : > { %1581 = vmatprep.subr.mxu1 %v1682_v2 }
 0xe4c   : > { %v880_v57 = vpop.f32.mrf.mxu1 }
 0xe4d   : > { %v884_v60 = vadd.f32 %v880_v57, %v278_v0 }
 0xe4e   : > { %v1547_v61 = vpop.f32.mrf.mxu1 }
 0xe4f   : > { %1646 = vtanh.f32 %v884_v60  ;;  %v1393_v3 = vmul.f32 -1.442695, %v884_v60 }
 0xe51   : > { %1648 = vpow2.f32 %v1393_v3 }
 0xe5c   : > { %v1647_v62 = vpop.eup %1646 }
 0xe5d   : > { %894 = vrot.lane.b32.xlu0 %v1647_v62, %s1684_s29 }
 0xe5e   : > { %v1649_v63 = vpop.eup %1648 }
 0xe5f   : > { %v888_v5 = vadd.f32 1.0, %v1649_v63 }
 0xe61   : > { %1650 = vrcp.f32 %v888_v5 }
 0xe6e   : > { %v1651_v1 = vpop.eup %1650 }
 0xe6f   : > { %v892_v7 = vmul.f32 %v1651_v1, %v800_v51 }
 0xecf   : > { %v895_v4 = vpop.permute.xlu0 %894 }
 0xed0   : > { %v897_v6 = vmul.f32 %v1651_v1, %v895_v4 }
 0xed2   : > { %899 = vrot.lane.b32.xlu1 %v897_v6, %s1684_s29 }
 0xf44   : > { %v900_v8 = vpop.permute.xlu1 %899 }
 0xf45   : > { %v902_v56 = vadd.f32 %v900_v8, %v892_v7 }
 0xf47   : > { %1652 = vtanh.f32 %v902_v56 }
 0xf54   : > { %v1653_v9 = vpop.eup %1652 }
 0xf55   : > { %905 = vrot.lane.b32.xlu0 %v1653_v9, %s1684_s29 }
 0xfc7   : > { %v906_v10 = vpop.permute.xlu0 %905 }
 0xfc8   : > { %v908_v12 = vmul.f32 %v1651_v1, %v906_v10 }
 0xfca   : > { %912 = vrot.lane.b32.xlu1 %v908_v12, %s1685_s30 }
0x103c   : > { %v913_v13 = vpop.permute.xlu1 %912 }
0x103d   : > { %1557 = vmatmul.mubr.msk.f32.vlgmr.msra.gmra.mxu0 %vm300_vm2, %v913_v13 }
0x103e   : > { %1578 = vmatprep.mubr.msk.f32.mxu0 %vm1683_vm1, %v1682_v2  ;;  %1571 = vmatpush3.msra.mxu0 %v1116_v43 }
0x103f   : > { %1572 = vmatprep.subr.mxu0 %v1682_v2 }
0x1040   : > { %1573 = vmatpush3.msra.mxu0 %v1115_v44 }
0x1041   : > { %1574 = vmatprep.subr.mxu0 %v1682_v2 }
0x1042   : > { %1575 = vmatpush3.msra.mxu0 %v1114_v45 }
0x1043   : > { %1576 = vmatprep.subr.mxu0 %v1682_v2 }
0x1044   : > { %1577 = vmatpush3.msra.mxu0 %v1113_v46 }
0x10fd   : > { %v982_v15 = vpop.f32.mrf.mxu0 }
0x10fe   : > { %v986_v16 = vadd.f32 %v982_v15, %v283_v14 }
0x10ff   : > { %v1558_v17 = vpop.f32.mrf.mxu0 }
0x1100   : > { %1654 = vtanh.f32 %v986_v16  ;;  %v1395_v19 = vmul.f32 -1.442695, %v986_v16 }
0x1102   : > { %1656 = vpow2.f32 %v1395_v19 }
0x110d   : > { %v1655_v18 = vpop.eup %1654 }
0x110e   : > { %996 = vrot.lane.b32.xlu0 %v1655_v18, %s1684_s29 }
0x110f   : > { %v1657_v20 = vpop.eup %1656 }
0x1110   : > { %v990_v21 = vadd.f32 1.0, %v1657_v20 }
0x1112   : > { %1658 = vrcp.f32 %v990_v21 }
0x111f   : > { %v1659_v22 = vpop.eup %1658 }
0x1120   : > { %v994_v25 = vmul.f32 %v1659_v22, %v902_v56 }
0x1180   : > { %v997_v23 = vpop.permute.xlu0 %996 }
0x1181   : > { %v999_v24 = vmul.f32 %v1659_v22, %v997_v23 }
0x1183   : > { %1001 = vrot.lane.b32.xlu1 %v999_v24, %s1684_s29 }
0x11f5   : > { %v1002_v26 = vpop.permute.xlu1 %1001 }
0x11f6   : > { %v1004_v59 = vadd.f32 %v1002_v26, %v994_v25 }
0x11f8   : > { %1660 = vtanh.f32 %v1004_v59 }
0x1205   : > { %v1661_v27 = vpop.eup %1660 }
0x1206   : > { %1007 = vrot.lane.b32.xlu0 %v1661_v27, %s1684_s29 }
0x1278   : > { %v1008_v28 = vpop.permute.xlu0 %1007 }
0x1279   : > { %v1010_v29 = vmul.f32 %v1659_v22, %v1008_v28 }
0x127b   : > { %1014 = vrot.lane.b32.xlu1 %v1010_v29, %s1685_s30 }
0x12ed   : > { %v1015_v30 = vpop.permute.xlu1 %1014 }
0x12ee   : > { %1568 = vmatmul.mubr.msk.f32.vlgmr.msra.gmra.mxu1 %vm300_vm2, %v1015_v30 }
0x12ef   : > { %1589 = vmatprep.mubr.msk.f32.mxu1 %vm1683_vm1, %v1682_v2  ;;  %1582 = vmatpush3.msra.mxu1 %v1201_v48 }
0x12f0   : > { %1583 = vmatprep.subr.mxu1 %v1682_v2 }
0x12f1   : > { %1584 = vmatpush3.msra.mxu1 %v1200_v52 }
0x12f2   : > { %1585 = vmatprep.subr.mxu1 %v1682_v2 }
0x12f3   : > { %1586 = vmatpush3.msra.mxu1 %v1199_v53 }
0x12f4   : > { %1587 = vmatprep.subr.mxu1 %v1682_v2  ;;  %v1400_v2 = vld [vmem:[%s1969_s1 + $0x80] ss:$0 sm:$0xff] }
0x12f5   : > { %1588 = vmatpush3.msra.mxu1 %v1198_v54 }
0x13ae   : > { %v1084_v32 = vpop.f32.mrf.mxu1 }
0x13af   : > { %v1088_v33 = vadd.f32 %v1084_v32, %v288_v31 }
0x13b0   : > { %v1569_v34 = vpop.f32.mrf.mxu1 }
0x13b1   : > { %1662 = vtanh.f32 %v1088_v33  ;;  %v1397_v36 = vmul.f32 -1.442695, %v1088_v33 }
0x13b3   : > { %1664 = vpow2.f32 %v1397_v36 }
0x13be   : > { %v1663_v35 = vpop.eup %1662 }
0x13bf   : > { %1098 = vrot.lane.b32.xlu0 %v1663_v35, %s1684_s29 }
0x13c0   : > { %v1665_v37 = vpop.eup %1664 }
0x13c1   : > { %v1092_v38 = vadd.f32 1.0, %v1665_v37 }
0x13c3   : > { %1666 = vrcp.f32 %v1092_v38 }
0x13d0   : > { %v1667_v39 = vpop.eup %1666 }
0x13d1   : > { %v1096_v42 = vmul.f32 %v1667_v39, %v1004_v59 }
0x1431   : > { %v1099_v40 = vpop.permute.xlu0 %1098 }
0x1432   : > { %v1101_v41 = vmul.f32 %v1667_v39, %v1099_v40 }
0x1434   : > { %1103 = vrot.lane.b32.xlu1 %v1101_v41, %s1684_s29 }
0x14a6   : > { %v1104_v11 = vpop.permute.xlu1 %1103 }
0x14a7   : > { %v1106_v58 = vadd.f32 %v1104_v11, %v1096_v42 }
0x14a9   : > { %1668 = vtanh.f32 %v1106_v58 }
0x14b6   : > { %v1669_v47 = vpop.eup %1668 }
0x14b7   : > { %1109 = vrot.lane.b32.xlu0 %v1669_v47, %s1684_s29 }
0x1529   : > { %v1110_v49 = vpop.permute.xlu0 %1109 }
0x152a   : > { %v1112_v50 = vmul.f32 %v1667_v39, %v1110_v49 }
0x152c   : > { %1123 = vrot.lane.b32.xlu1 %v1112_v50, %s1685_s30 }
0x159e   : > { %v1124_v51 = vpop.permute.xlu1 %1123 }
0x159f   : > { %1295 = vst.msk [vmem:[%s1920_s12] sm:$0xff] %vm300_vm2, %v1124_v51  ;;  %1579 = vmatmul.mubr.msk.f32.vlgmr.msra.gmra.mxu0 %vm300_vm2, %v1124_v51 }
0x165f   : > { %v1193_v0 = vpop.f32.mrf.mxu0 }
0x1660   : > { %v1194_v57 = vadd.f32 %v1398_v55, %v1193_v0 }
0x1661   : > { %v1580_v60 = vpop.f32.mrf.mxu0 }
0x1662   : > { %v1197_v61 = vmax.f32 %v1194_v57, 0.0 }
0x1664   : > { %1296 = vrot.lane.b32.xlu1 %v1197_v61, %s1684_s29  ;;  %1590 = vmatmul.mubr.msk.f32.vlgmr.msra.gmra.mxu1 %vm300_vm2, %v1197_v61  ;;  %s1687_s29 = smov 65  }
0x16d6   : > { %v1297_v62 = vpop.permute.xlu1 %1296 }
0x16d7   : > { %1300 = vst.msk [vmem:[%s1920_s12] sm:$0xff] %vm1299_vm3, %v1297_v62 }
0x1724   : > { %v1276_v3 = vpop.f32.mrf.mxu1 }
0x1725   : > { %v1277_v63 = vadd.f32 %v1400_v2, %v1276_v3 }
0x1726   : > { %v1591_v5 = vpop.f32.mrf.mxu1 }
0x1727   : > { %v1280_v1 = vmax.f32 %v1277_v63, 0.0 }
0x1729   : > { %1282 = vrot.lane.b32.xlu0 %v1280_v1, %s1686_s28 }
0x179b   : > { %v1283_v4 = vpop.permute.xlu0 %1282 }
0x179c   : > { %v1285_v6 = vsub.f32 %v1280_v1, %v1283_v4 }
0x179e   : > { %v1402_v7 = vmul.f32 -1.442695, %v1285_v6 }
0x17a0   : > { %1670 = vpow2.f32 %v1402_v7 }
0x17ad   : > { %v1671_v8 = vpop.eup %1670 }
0x17ae   : > { %v1289_v56 = vadd.f32 1.0, %v1671_v8 }
0x17b0   : > { %1672 = vrcp.f32 %v1289_v56 }
0x17bd   : > { %v1673_v9 = vpop.eup %1672 }
0x17be   : > { %1302 = vrot.lane.b32.xlu0 %v1673_v9, %s1685_s30  ;;  %v1292_v10 = vsub.f32 1.0, %v1673_v9 }
0x17c0   : > { %1308 = vrot.lane.b32.xlu1 %v1292_v10, %s1687_s29 }
0x1830   : > { %v1303_v12 = vpop.permute.xlu0 %1302 }
0x1831   : > { %1306 = vst.msk [vmem:[%s1920_s12] sm:$0xff] %vm1305_vm4, %v1303_v12 }
0x1832   : > { %v1309_v13 = vpop.permute.xlu1 %1308 }
0x1833   : > { %1312 = vst.msk [vmem:[%s1920_s12] sm:$0xff] %vm1311_vm5, %v1309_v13 }
0x1834 PF: > { %s12_s9 = sadd.s32 1, %s1680_s9  }
0x1835   : > { %p9_p4 = scmp.ge.s32.totalorder %s12_s9, 4  }
0x1837   :  { %11 = sbr.rel (!%p9_p4) target bundleno = 1 (0x1), region = 65 }

</bundles_post_ra>
